<compile_context>
chip_gen: v7x
topology: tpu7x:2x2x1
jax: 0.10.0
libtpu: 0.0.40
codegen_flags: <defaults>
</compile_context>

<pallas_src>
import math
from functools import partial

import numpy as np
import jax
import jax.numpy as jnp
from jax.experimental import pallas as pl
from jax.experimental.pallas import tpu as pltpu


_SQRT_2_OVER_PI = math.sqrt(2.0 / math.pi)


def _gelu_new(x):
    # GPT-2 "gelu_new": 0.5*x*(1 + tanh(sqrt(2/pi)*(x + 0.044715*x^3)))
    return 0.5 * x * (1.0 + jnp.tanh(_SQRT_2_OVER_PI * (x + 0.044715 * x * x * x)))


def _round_up(x, m):
    return (x + m - 1) // m * m


def _ceil_div(a, b):
    return -(-a // b)


# --------------------------------------------------------------------------- #
# Kernels
# --------------------------------------------------------------------------- #
def _mlp_kernel_resident(x_ref, w1_ref, b1_ref, w2_ref, b2_ref, o_ref, acc_ref, *, tk):
    """Weights resident in VMEM; intermediate dim chunked in-kernel (tk lanes)."""
    i_pad = w1_ref.shape[1]
    n_chunks = i_pad // tk
    # Initialize the f32 accumulator with the (broadcast) output bias.
    acc_ref[...] = jnp.broadcast_to(b2_ref[...], acc_ref.shape)
    for c in range(n_chunks):                       # static unroll; static slices
        lo, hi = c * tk, (c + 1) * tk
        h = jnp.dot(x_ref[...], w1_ref[:, lo:hi],
                    preferred_element_type=jnp.float32)
        h = _gelu_new(h + b1_ref[:, lo:hi])         # bias + gelu in f32
        acc_ref[...] += jnp.dot(h.astype(w2_ref.dtype), w2_ref[lo:hi, :],
                                preferred_element_type=jnp.float32)
    o_ref[...] = acc_ref[...].astype(o_ref.dtype)


def _mlp_kernel_streamed(x_ref, w1_ref, b1_ref, w2_ref, b2_ref, o_ref, acc_ref):
    """Weight tiles streamed over a reduction grid axis (k) over the intermediate dim."""
    k = pl.program_id(1)

    @pl.when(k == 0)
    def _():
        acc_ref[...] = jnp.zeros_like(acc_ref)

    h = jnp.dot(x_ref[...], w1_ref[...], preferred_element_type=jnp.float32)
    h = _gelu_new(h + b1_ref[...])
    acc_ref[...] += jnp.dot(h.astype(w2_ref.dtype), w2_ref[...],
                            preferred_element_type=jnp.float32)

    @pl.when(k == pl.num_programs(1) - 1)
    def _():
        o_ref[...] = (acc_ref[...] + b2_ref[...]).astype(o_ref.dtype)


# --------------------------------------------------------------------------- #
# Wrapper helpers
# --------------------------------------------------------------------------- #
def _const_spec(shape):
    """BlockSpec for a grid-invariant (resident) block on a 1-D grid.

    Constant index_map -> a single buffer suffices (nothing to overlap).
    Returns (spec, buffered_flag) so the VMEM estimate can account for a
    silent fallback to the default double-buffered spec.
    """
    index_map = lambda i: (0,) * len(shape)
    try:
        return pl.BlockSpec(shape, index_map, pipeline_mode=pl.Buffered(1)), True
    except Exception:
        return pl.BlockSpec(shape, index_map), False


def _vmem_budget_bytes():
    """Generation-aware VMEM budget (~0.85x capacity, conservative fallback)."""
    try:
        cap = int(pltpu.get_tpu_info().vmem_capacity_bytes)
    except Exception:
        cap = 64 << 20                 # v7x-sized conservative fallback
    return int(cap * 0.85)


def prepare_backpack_mlp_params(w_fc, b_fc, w_proj, b_proj, *,
                                compute_dtype=jnp.bfloat16, tk_target=512):
    """One-time weight preparation (hoisted out of the per-call path).

    Casts weights to the MXU compute dtype, pads the intermediate dim to a
    multiple of the in-kernel chunk size `tk` (zeros -> gelu_new(0) == 0, so
    padded columns contribute exactly 0), and pads the output dim to a 128-lane
    multiple for lane-dense stores.
    """
    E, I = w_fc.shape
    I2, O = w_proj.shape
    assert I2 == I, "weight shapes inconsistent"

    n_chunks = max(1, _ceil_div(I, tk_target))
    tk = _round_up(_ceil_div(I, n_chunks), 128)
    I_pad = n_chunks * tk
    O_pad = _round_up(O, 128)

    w1 = jnp.pad(w_fc.astype(compute_dtype), ((0, 0), (0, I_pad - I)))
    b1 = jnp.pad(b_fc.astype(jnp.float32).reshape(1, I), ((0, 0), (0, I_pad - I)))
    w2 = jnp.pad(w_proj.astype(compute_dtype), ((0, I_pad - I), (0, O_pad - O)))
    b2 = jnp.pad(b_proj.astype(jnp.float32).reshape(1, O), ((0, 0), (0, O_pad - O)))

    meta = dict(out_dim=int(O), tk=int(tk))
    return w1, b1, w2, b2, meta


def backpack_mlp(hidden_states, w1, b1, w2, b2, *, out_dim, tk, tm=256,
                 out_dtype=None, weights_resident=None):
    """Fused Conv1D -> gelu_new -> Conv1D.  dropout == identity (inference mode).

    Takes the *prepared* params from prepare_backpack_mlp_params (already cast
    to the compute dtype and lane-padded), so no per-call weight cast/pad HBM
    traffic occurs here.  Pass out_dtype=jnp.bfloat16 to halve output store
    traffic when the consumer tolerates a bf16 residual stream.
    """
    B, S, E = hidden_states.shape
    E_w, I_pad = w1.shape
    I_w, O_pad = w2.shape
    assert E_w == E and I_w == I_pad and I_pad % tk == 0

    compute_dtype = w1.dtype
    itemsize = np.dtype(compute_dtype).itemsize
    out_dtype = hidden_states.dtype if out_dtype is None else out_dtype
    out_itemsize = np.dtype(out_dtype).itemsize

    M = B * S
    # bf16 packs 16 rows per sublane group -> align row tiles to 16.
    align = 16 if itemsize == 2 else (32 if itemsize == 1 else 8)
    tm_eff = _round_up(min(tm, _round_up(M, align)), align)
    # v7x megacore: guarantee >= 2 parallel M-grid steps whenever possible.
    if _round_up(M, tm_eff) // tm_eff < 2 and tm_eff >= 2 * align:
        tm_eff = _round_up(_ceil_div(M, 2), align)
    M_pad = _round_up(M, tm_eff)
    n_m = M_pad // tm_eff
    n_k = I_pad // tk

    x2d = hidden_states.reshape(M, E).astype(compute_dtype)
    if M_pad != M:
        x2d = jnp.pad(x2d, ((0, M_pad - M), (0, 0)))

    budget = _vmem_budget_bytes()

    # Resident-path VMEM footprint (weights + biases live in VMEM across all M tiles).
    w1_spec, w1_buf = _const_spec((E, I_pad))
    b1_spec, _ = _const_spec((1, I_pad))
    w2_spec, w2_buf = _const_spec((I_pad, O_pad))
    b2_spec, _ = _const_spec((1, O_pad))
    wfactor = 1 if (w1_buf and w2_buf) else 2           # silent fallback => double buffered
    resident_bytes = (wfactor * ((E * I_pad + I_pad * O_pad) * itemsize
                                 + (I_pad + O_pad) * 4)
                      + 2 * tm_eff * E * itemsize        # x tile (double-buffered)
                      + 2 * tm_eff * O_pad * out_itemsize  # out tile (double-buffered)
                      + tm_eff * O_pad * 4                # f32 accumulator scratch
                      + tm_eff * tk * (4 + itemsize)      # per-chunk h (f32 + bf16 copy)
                      + (2 << 20))                        # Mosaic internal slack

    if weights_resident is None:
        weights_resident = resident_bytes <= budget

    if weights_resident:
        grid = (n_m,)
        kernel = partial(_mlp_kernel_resident, tk=tk)
        in_specs = [
            pl.BlockSpec((tm_eff, E), lambda i: (i, 0)),   # x tile (pipelined)
            w1_spec,                                        # W_fc   (resident)
            b1_spec,                                        # b_fc   (resident)
            w2_spec,                                        # W_proj (resident)
            b2_spec,                                        # b_proj (resident)
        ]
        out_specs = pl.BlockSpec((tm_eff, O_pad), lambda i: (i, 0))
        dim_sem = ("parallel",)
        weight_fetches = 1
    else:
        # K-tiled fallback: stream W_fc column tiles / W_proj row tiles over the
        # I axis (reduction for the second matmul), accumulator held in VMEM.
        grid = (n_m, n_k)
        kernel = _mlp_kernel_streamed
        in_specs = [
            pl.BlockSpec((tm_eff, E), lambda i, k: (i, 0)),
            pl.BlockSpec((E, tk), lambda i, k: (0, k)),
            pl.BlockSpec((1, tk), lambda i, k: (0, k)),
            pl.BlockSpec((tk, O_pad), lambda i, k: (k, 0)),
            pl.BlockSpec((1, O_pad), lambda i, k: (0, 0)),
        ]
        out_specs = pl.BlockSpec((tm_eff, O_pad), lambda i, k: (i, 0))
        dim_sem = ("parallel", "arbitrary")
        weight_fetches = n_m

    cost = pl.CostEstimate(
        flops=int(2 * M_pad * (E * I_pad + I_pad * O_pad)),
        transcendentals=int(M_pad * I_pad),                 # one tanh per intermediate act
        bytes_accessed=int(M_pad * E * itemsize
                           + weight_fetches * ((E * I_pad + I_pad * O_pad) * itemsize
                                               + (I_pad + O_pad) * 4)
                           + M_pad * O_pad * out_itemsize),
    )

    vmem_limit = int(min(budget, 128 << 20))

    out2d = pl.pallas_call(
        kernel,
        out_shape=jax.ShapeDtypeStruct((M_pad, O_pad), out_dtype),
        grid_spec=pltpu.PrefetchScalarGridSpec(
            num_scalar_prefetch=0,
            grid=grid,
            in_specs=in_specs,
            out_specs=out_specs,
            scratch_shapes=[pltpu.VMEM((tm_eff, O_pad), jnp.float32)],
        ),
        compiler_params=pltpu.CompilerParams(
            dimension_semantics=dim_sem,
            vmem_limit_bytes=vmem_limit),
        cost_estimate=cost,
    )(x2d, w1, b1, w2, b2)

    return out2d[:M, :out_dim].reshape(B, S, out_dim)


def _reference(hidden_states, w_fc, b_fc, w_proj, b_proj):
    h = jnp.einsum("bse,ei->bsi", hidden_states, w_fc) + b_fc
    h = _gelu_new(h)
    return jnp.einsum("bsi,io->bso", h, w_proj) + b_proj


if __name__ == "__main__":
    # Small shapes consistent with the module: embed_dim=32, intermediate=4*32=128,
    # out_dim=32 (standard GPT-2 MLP shape), batch=2, seq=8.
    B, S, E = 2, 8, 32
    I, O = 4 * E, E

    key = jax.random.PRNGKey(0)
    k1, k2, k3, k4, k5 = jax.random.split(key, 5)

    hidden_states = jax.random.normal(k1, (B, S, E), dtype=jnp.float32)
    w_fc = 0.02 * jax.random.normal(k2, (E, I), dtype=jnp.float32)
    b_fc = 0.01 * jax.random.normal(k3, (I,), dtype=jnp.float32)
    w_proj = 0.02 * jax.random.normal(k4, (I, O), dtype=jnp.float32)
    b_proj = 0.01 * jax.random.normal(k5, (O,), dtype=jnp.float32)

    # One-time parameter preparation (cast + pad hoisted out of the call path).
    w1, b1, w2, b2, meta = prepare_backpack_mlp_params(w_fc, b_fc, w_proj, b_proj)

    ref = _reference(hidden_states, w_fc, b_fc, w_proj, b_proj)

    # 1) Resident-weight path (auto-selected at these shapes).
    out_res = backpack_mlp(hidden_states, w1, b1, w2, b2, **meta)
    out_res = jax.block_until_ready(out_res)
    assert out_res.shape == (B, S, O), out_res.shape
    err_res = float(jnp.max(jnp.abs(out_res - ref)))
    assert jnp.allclose(out_res, ref, atol=1e-2, rtol=1e-2), f"resident mismatch: {err_res}"

    # 2) Streamed-weight path (large-E fallback), forced here for coverage.
    out_str = backpack_mlp(hidden_states, w1, b1, w2, b2, weights_resident=False, **meta)
    out_str = jax.block_until_ready(out_str)
    err_str = float(jnp.max(jnp.abs(out_str - ref)))
    assert jnp.allclose(out_str, ref, atol=1e-2, rtol=1e-2), f"streamed mismatch: {err_str}"

    print("KERNEL_OK")
</pallas_src>

<mosaic_0001>
module attributes {stable_mosaic.version = 11 : i64} {
  func.func @_mlp_kernel_resident(%arg0: i32, %arg1: memref<16x32xbf16, #tpu.memory_space<vmem>>, %arg2: memref<32x128xbf16, #tpu.memory_space<vmem>>, %arg3: memref<1x128xf32, #tpu.memory_space<vmem>>, %arg4: memref<128x128xbf16, #tpu.memory_space<vmem>>, %arg5: memref<1x128xf32, #tpu.memory_space<vmem>>, %arg6: memref<16x128xf32, #tpu.memory_space<vmem>>, %arg7: memref<16x128xf32, #tpu.memory_space<vmem>>) attributes {dimension_semantics = [#tpu.dimension_semantics<parallel>], iteration_bounds = array<i64: 1>, scalar_prefetch = 0 : i64, scratch_operands = 1 : i64, tpu.core_type = #tpu.core_type<tc>, window_params = [{transform_indices = @transform_0, window_bounds = array<i64: 16, 32>}, {pipeline_mode = #tpu.pipeline_mode<synchronous>, transform_indices = @transform_1, window_bounds = array<i64: 32, 128>}, {pipeline_mode = #tpu.pipeline_mode<synchronous>, transform_indices = @transform_2, window_bounds = array<i64: 1, 128>}, {pipeline_mode = #tpu.pipeline_mode<synchronous>, transform_indices = @transform_3, window_bounds = array<i64: 128, 128>}, {pipeline_mode = #tpu.pipeline_mode<synchronous>, transform_indices = @transform_4, window_bounds = array<i64: 1, 128>}, {transform_indices = @transform_5, window_bounds = array<i64: 16, 128>}]} {
    %c0 = arith.constant 0 : index
    %c0_0 = arith.constant 0 : index
    %0 = vector.load %arg5[%c0, %c0_0] : memref<1x128xf32, #tpu.memory_space<vmem>>, vector<1x128xf32>
    %1 = vector.shape_cast %0 : vector<1x128xf32> to vector<1x128xf32>
    %2 = vector.broadcast %1 : vector<1x128xf32> to vector<16x128xf32>
    %c0_1 = arith.constant 0 : index
    %c0_2 = arith.constant 0 : index
    %3 = vector.load %arg7[%c0_1, %c0_2] : memref<16x128xf32, #tpu.memory_space<vmem>>, vector<16x128xf32>
    tpu.vector_store %arg7[%c0_1, %c0_2], %2 {strides = array<i32>} : memref<16x128xf32, #tpu.memory_space<vmem>>, vector<16x128xf32>,
    %c0_3 = arith.constant 0 : index
    %c0_4 = arith.constant 0 : index
    %4 = vector.load %arg1[%c0_3, %c0_4] : memref<16x32xbf16, #tpu.memory_space<vmem>>, vector<16x32xbf16>
    %c0_5 = arith.constant 0 : index
    %c0_6 = arith.constant 0 : index
    %5 = vector.load %arg2[%c0_5, %c0_6] : memref<32x128xbf16, #tpu.memory_space<vmem>>, vector<32x128xbf16>
    %cst = arith.constant dense<0.000000e+00> : vector<16x128xf32>
    %6 = tpu.matmul %4, %5, %cst {dimension_numbers = #tpu.dot_dimension_numbers<[1], [0], [0], [1], [0, 0, 1, 1], [], []>} : vector<16x32xbf16>, vector<32x128xbf16>, vector<16x128xf32> -> vector<16x128xf32>
    %c0_7 = arith.constant 0 : index
    %c0_8 = arith.constant 0 : index
    %7 = vector.load %arg3[%c0_7, %c0_8] : memref<1x128xf32, #tpu.memory_space<vmem>>, vector<1x128xf32>
    %8 = vector.broadcast %7 : vector<1x128xf32> to vector<16x128xf32>
    %9 = arith.addf %6, %8 : vector<16x128xf32>
    %cst_9 = arith.constant 5.000000e-01 : f32
    %10 = vector.broadcast %cst_9 : f32 to vector<16x128xf32>
    %11 = arith.mulf %10, %9 : vector<16x128xf32>
    %cst_10 = arith.constant 4.471500e-02 : f32
    %12 = vector.broadcast %cst_10 : f32 to vector<16x128xf32>
    %13 = arith.mulf %12, %9 : vector<16x128xf32>
    %14 = arith.mulf %13, %9 : vector<16x128xf32>
    %15 = arith.mulf %14, %9 : vector<16x128xf32>
    %16 = arith.addf %9, %15 : vector<16x128xf32>
    %cst_11 = arith.constant 0.797884583 : f32
    %17 = vector.broadcast %cst_11 : f32 to vector<16x128xf32>
    %18 = arith.mulf %17, %16 : vector<16x128xf32>
    %19 = math.tanh %18 : vector<16x128xf32>
    %cst_12 = arith.constant 1.000000e+00 : f32
    %20 = vector.broadcast %cst_12 : f32 to vector<16x128xf32>
    %21 = arith.addf %20, %19 : vector<16x128xf32>
    %22 = arith.mulf %11, %21 : vector<16x128xf32>
    %c0_13 = arith.constant 0 : index
    %c0_14 = arith.constant 0 : index
    %23 = vector.load %arg7[%c0_13, %c0_14] : memref<16x128xf32, #tpu.memory_space<vmem>>, vector<16x128xf32>
    %24 = arith.truncf %22 : vector<16x128xf32> to vector<16x128xbf16>
    %c0_15 = arith.constant 0 : index
    %c0_16 = arith.constant 0 : index
    %25 = vector.load %arg4[%c0_15, %c0_16] : memref<128x128xbf16, #tpu.memory_space<vmem>>, vector<128x128xbf16>
    %cst_17 = arith.constant dense<0.000000e+00> : vector<16x128xf32>
    %26 = tpu.matmul %24, %25, %cst_17 {dimension_numbers = #tpu.dot_dimension_numbers<[1], [0], [0], [1], [0, 0, 1, 1], [], []>} : vector<16x128xbf16>, vector<128x128xbf16>, vector<16x128xf32> -> vector<16x128xf32>
    %27 = arith.addf %23, %26 : vector<16x128xf32>
    %c0_18 = arith.constant 0 : index
    %c0_19 = arith.constant 0 : index
    %28 = vector.load %arg7[%c0_18, %c0_19] : memref<16x128xf32, #tpu.memory_space<vmem>>, vector<16x128xf32>
    tpu.vector_store %arg7[%c0_18, %c0_19], %27 {strides = array<i32>} : memref<16x128xf32, #tpu.memory_space<vmem>>, vector<16x128xf32>,
    %c0_20 = arith.constant 0 : index
    %c0_21 = arith.constant 0 : index
    %29 = vector.load %arg7[%c0_20, %c0_21] : memref<16x128xf32, #tpu.memory_space<vmem>>, vector<16x128xf32>
    %c0_22 = arith.constant 0 : index
    %c0_23 = arith.constant 0 : index
    %30 = vector.load %arg6[%c0_22, %c0_23] : memref<16x128xf32, #tpu.memory_space<vmem>>, vector<16x128xf32>
    tpu.vector_store %arg6[%c0_22, %c0_23], %29 {strides = array<i32>} : memref<16x128xf32, #tpu.memory_space<vmem>>, vector<16x128xf32>,
    return
  }
  func.func @transform_0(%arg0: i32) -> (i32, i32) {
    %c0_i32 = arith.constant 0 : i32
    %c0_i32_0 = arith.constant 0 : i32
    return %arg0, %c0_i32 : i32, i32
  }
  func.func @transform_1(%arg0: i32) -> (i32, i32) {
    %c0_i32 = arith.constant 0 : i32
    %c0_i32_0 = arith.constant 0 : i32
    %c0_i32_1 = arith.constant 0 : i32
    return %c0_i32, %c0_i32_0 : i32, i32
  }
  func.func @transform_2(%arg0: i32) -> (i32, i32) {
    %c0_i32 = arith.constant 0 : i32
    %c0_i32_0 = arith.constant 0 : i32
    %c0_i32_1 = arith.constant 0 : i32
    return %c0_i32, %c0_i32_0 : i32, i32
  }
  func.func @transform_3(%arg0: i32) -> (i32, i32) {
    %c0_i32 = arith.constant 0 : i32
    %c0_i32_0 = arith.constant 0 : i32
    %c0_i32_1 = arith.constant 0 : i32
    return %c0_i32, %c0_i32_0 : i32, i32
  }
  func.func @transform_4(%arg0: i32) -> (i32, i32) {
    %c0_i32 = arith.constant 0 : i32
    %c0_i32_0 = arith.constant 0 : i32
    %c0_i32_1 = arith.constant 0 : i32
    return %c0_i32, %c0_i32_0 : i32, i32
  }
  func.func @transform_5(%arg0: i32) -> (i32, i32) {
    %c0_i32 = arith.constant 0 : i32
    %c0_i32_0 = arith.constant 0 : i32
    return %arg0, %c0_i32 : i32, i32
  }
}

</mosaic_0001>

<bundles_post_ra>
// kernel: tpu_custom_call.1
= control target key start
LH: loop header
LB: loop body
LE: loop exit
PB: predicated region body
PF: predicated region fallthrough
CT: control target
= control target key end

     0   :  { %10 = vsyncpa [#allocation4], 0  ;;  %s582_s0 = inlined_call_operand.hbm [shape: bf16[16,32], index: 0, kind: input, shape index: {}]   ;;  %s583_s1 = inlined_call_operand.hbm [shape: bf16[32,128], index: 1, kind: input, shape index: {}]   ;;  %s584_s2 = inlined_call_operand.vmem [shape: f32[1,128], index: 2, kind: input, shape index: {}]   ;;  %s585_s3 = inlined_call_operand.hbm [shape: bf16[128,128], index: 3, kind: input, shape index: {}]   ;;  %s586_s4 = inlined_call_operand.vmem [shape: f32[1,128], index: 4, kind: input, shape index: {}]   ;;  %s587_s5 = inlined_call_operand.hbm [shape: f32[16,128], index: 5, kind: output, shape index: {}]  }
   0x1   :  { %11 = vsyncpa [#allocation7], 0 }
   0x2   :  { %12 = vsyncpa [#allocation5], 0  ;;  %s472_s18 = smov [#allocation6]   ;;  %s473_s20 = smov [#allocation3]  }
   0x3   :  { %s30_s19 = sshll.u32 %s472_s18, 4  ;;  %s18_s21 = sshll.u32 %s473_s20, 4  ;;  %s31_s19 = int_to_ptr.vmem [resolvable:$true] %s30_s19  ;;  %s512_s21 = int_to_ptr.vmem [resolvable:$true] %s18_s21 }
   0x4   :  { %s378_s24 = scalar_lea.hbm %s583_s1, 256 }
   0x5   :  { %p379_p0 = scmp.ne.s32.totalorder %s583_s1, %s378_s24  ;;  %p382_p1 = scmp.lt.u32.totalorder %s378_s24, %s583_s1 }
   0x7   :  { %p384_p2 = pnand %p382_p1, %p379_p0 }
   0x9   :  { %387 = shalt.err (!%p384_p2)
}
   0xa   :  { %s388_s29 = scalar_lea.vmem %s31_s19, 256  ;;  %p393_p4 = scmp.lt.s32.totalorder %s31_s19, %s31_s19 }
   0xb   :  { %p389_p3 = scmp.ne.s32.totalorder %s31_s19, %s388_s29  ;;  %p394_p5 = scmp.lt.s32.totalorder %s388_s29, %s388_s29 }
   0xd   :  { %p395_p6 = por %p394_p5, %p393_p4 }
   0xf   :  { %p396_p7 = pnand %p395_p6, %p389_p3 }
  0x11   :  { %399 = shalt.err (!%p396_p7)
}
  0x12   :  { %s474_s30 = smov 64   ;;  %s475_s6 = smov 4  }
  0x13   :  { %36 = dma.hbm_to_vmem [thread:$0]  %s583_s1, 256, %s31_s19, [#allocation7], %s474_s30, %s474_s30, %s475_s6  }
  0x14   :  { %s400_s11 = scalar_lea.hbm %s582_s0, 128 }
  0x15   :  { %p401_p8 = scmp.ne.s32.totalorder %s582_s0, %s400_s11  ;;  %p404_p9 = scmp.lt.u32.totalorder %s400_s11, %s582_s0 }
  0x17   :  { %p406_p10 = pnand %p404_p9, %p401_p8 }
  0x19   :  { %409 = shalt.err (!%p406_p10)
}
  0x1a   :  { %s410_s16 = scalar_lea.vmem %s512_s21, 128  ;;  %p415_p12 = scmp.lt.s32.totalorder %s512_s21, %s512_s21 }
  0x1b   :  { %p411_p11 = scmp.ne.s32.totalorder %s512_s21, %s410_s16  ;;  %p416_p13 = scmp.lt.s32.totalorder %s410_s16, %s410_s16 }
  0x1d   :  { %p417_p0 = por %p416_p13, %p415_p12 }
  0x1f   :  { %p418_p1 = pnand %p417_p0, %p411_p11 }
  0x21   :  { %421 = shalt.err (!%p418_p1)
}
  0x22   :  { %24 = dma.hbm_to_vmem [thread:$0]  %s582_s0, 128, %s512_s21, [#allocation4], %s474_s30, %s474_s30, %s475_s6  }
  0x23   :  { %s476_s18 = smov [#allocation8]   ;;  %s422_s23 = scalar_lea.hbm %s585_s3, 1024 }
  0x24   :  { %s44_s19 = sshll.u32 %s476_s18, 4  ;;  %p423_p2 = scmp.ne.s32.totalorder %s585_s3, %s422_s23  ;;  %s45_s19 = int_to_ptr.vmem [resolvable:$true] %s44_s19 }
  0x25   :  { %p426_p3 = scmp.lt.u32.totalorder %s422_s23, %s585_s3 }
  0x27   :  { %p428_p4 = pnand %p426_p3, %p423_p2 }
  0x29   :  { %431 = shalt.err (!%p428_p4)
}
  0x2a   :  { %s432_s28 = scalar_lea.vmem %s45_s19, 1024  ;;  %p437_p6 = scmp.lt.s32.totalorder %s45_s19, %s45_s19 }
  0x2b   :  { %p433_p5 = scmp.ne.s32.totalorder %s45_s19, %s432_s28  ;;  %p438_p7 = scmp.lt.s32.totalorder %s432_s28, %s432_s28 }
  0x2d   :  { %p439_p8 = por %p438_p7, %p437_p6 }
  0x2f   :  { %p440_p9 = pnand %p439_p8, %p433_p5 }
  0x31   :  { %443 = shalt.err (!%p440_p9)
}
  0x32   :  { %50 = dma.hbm_to_vmem [thread:$0]  %s585_s3, 1024, %s45_s19, [#allocation7], %s474_s30, %s474_s30, %s475_s6  }
  0x33   :  { %466 = dma.done.wait [#allocation4], 128  }
  0x34   :  { %467 = vsyncadd [#allocation4], 4294967168 }
  0x35   :  { %468 = dma.done.wait [#allocation7], 1280  }
  0x36   :  { %469 = vsyncadd [#allocation7], 4294966016  ;;  %v477_v0 = vmov 0.0   ;;  %vm478_vm0 = vmmov 0   ;;  %v363_v1 = vld [vmem:[#allocation6] sm:$0xff]   ;;  %v364_v2 = vld [vmem:[#allocation6 + $0x8] sm:$0xff]  }
  0x37   :  { %325 = vmatprep.subr.bf16.mxu0 %v477_v0  ;;  %329 = vmatprep.mubr.msk.bf16.mxu0 %vm478_vm0, %v477_v0  ;;  %v365_v3 = vld [vmem:[#allocation3] sm:$0xff]   ;;  %vm102_vm1 = vcmask 261120   ;;  %v366_v4 = vld [vmem:[#allocation8] sm:$0xff]   ;;  %v368_v6 = vld [vmem:[#allocation8 + $0x10] sm:$0xff]   ;;  %s479_s6 = smov [#allocation9]  }
  0x38   :  { %333 = vmatprep.subr.bf16.mxu1 %v477_v0  ;;  %349 = vmatprep.mubr.msk.bf16.mxu1 %vm478_vm0, %v477_v0  ;;  %v367_v5 = vld [vmem:[#allocation8 + $0x8] sm:$0xff]   ;;  %v369_v7 = vld [vmem:[#allocation8 + $0x18] sm:$0xff]   ;;  %v370_v8 = vld [vmem:[#allocation8 + $0x20] sm:$0xff]   ;;  %s286_s7 = sshll.u32 %s479_s6, 4  ;;  %s287_s7 = int_to_ptr.vmem [resolvable:$true] %s286_s7 }
  0x39   :  { %326 = vmatpush3.bf16.msra.mxu0 %v363_v1  ;;  %334 = vmatpush3.bf16.msra.mxu1 %v366_v4  ;;  %v371_v9 = vld [vmem:[#allocation8 + $0x28] sm:$0xff]   ;;  %v372_v10 = vld [vmem:[#allocation8 + $0x30] sm:$0xff]   ;;  %v373_v11 = vld [vmem:[#allocation8 + $0x38] sm:$0xff]   ;;  %s444_s8 = scalar_lea.vmem %s287_s7, 256  ;;  %p449_p11 = scmp.lt.s32.totalorder %s287_s7, %s287_s7 }
  0x3a   :  { %327 = vmatprep.subr.bf16.mxu0 %v477_v0  ;;  %335 = vmatprep.subr.bf16.mxu1 %v477_v0  ;;  %v300_v12 = vld [vmem:[%s584_s2] ss:$0 sm:$0xff]  ;;  %p445_p10 = scmp.ne.s32.totalorder %s287_s7, %s444_s8  ;;  %p450_p12 = scmp.lt.s32.totalorder %s444_s8, %s444_s8 }
  0x3b   :  { %v299_v38 = vld [vmem:[%s586_s4] ss:$0 sm:$0xff] }
  0x3c   :  { %p451_p13 = por %p450_p12, %p449_p11 }
  0x3d   :  { %328 = vmatpush3.bf16.msra.mxu0 %v364_v2  ;;  %336 = vmatpush3.bf16.msra.mxu1 %v367_v5 }
  0x3e   :  { %337 = vmatprep.subr.bf16.mxu1 %v477_v0  ;;  %p452_p0 = pnand %p451_p13, %p445_p10 }
  0x40   :  { %330 = vmatmul.mubr.msk.bf16.vlgmr.msra.gmra.mrb[0].mxu0 %vm102_vm1, %v365_v3 }
  0x41   :  { %338 = vmatpush3.bf16.msra.mxu1 %v368_v6 }
  0x42   :  { %339 = vmatprep.subr.bf16.mxu1 %v477_v0 }
  0x45   :  { %340 = vmatpush3.bf16.msra.mxu1 %v369_v7 }
  0x46   :  { %341 = vmatprep.subr.bf16.mxu1 %v477_v0 }
  0x49   :  { %342 = vmatpush3.bf16.msra.mxu1 %v370_v8 }
  0x4a   :  { %343 = vmatprep.subr.bf16.mxu1 %v477_v0 }
  0x4d   :  { %344 = vmatpush3.bf16.msra.mxu1 %v371_v9 }
  0x4e   :  { %345 = vmatprep.subr.bf16.mxu1 %v477_v0 }
  0x51   :  { %346 = vmatpush3.bf16.msra.mxu1 %v372_v10 }
  0x52   :  { %347 = vmatprep.subr.bf16.mxu1 %v477_v0 }
  0x55   :  { %348 = vmatpush3.bf16.msra.mxu1 %v373_v11 }
 0x113   :  { %v140_v13 = vpop.f32.mrb[0].mxu0 }
 0x114   :  { %v141_v14 = vadd.f32 %v300_v12, %v140_v13  ;;  %v331_v15 = vpop.f32.mrb[1].mxu0 }
 0x115   :  { %v143_v16 = vpop.f32.mrb[2].mxu0 }
 0x116   :  { %v149_v17 = vmul.f32 0.044715, %v141_v14  ;;  %v144_v18 = vadd.f32 %v300_v12, %v143_v16  ;;  %v332_v19 = vpop.f32.mrb[3].mxu0  ;;  %v147_v32 = vmul.f32 0.5, %v141_v14 }
 0x118   :  { %v151_v20 = vmul.f32 %v149_v17, %v141_v14  ;;  %v150_v21 = vmul.f32 0.044715, %v144_v18  ;;  %v148_v33 = vmul.f32 0.5, %v144_v18 }
 0x11a   :  { %v153_v22 = vmul.f32 %v151_v20, %v141_v14  ;;  %v152_v23 = vmul.f32 %v150_v21, %v144_v18 }
 0x11c   :  { %v154_v24 = vmul.f32 %v152_v23, %v144_v18  ;;  %v155_v25 = vadd.f32 %v153_v22, %v141_v14 }
 0x11e   :  { %v156_v26 = vadd.f32 %v154_v24, %v144_v18  ;;  %v157_v27 = vmul.f32 0.7978846, %v155_v25 }
 0x120   :  { %v158_v28 = vmul.f32 0.7978846, %v156_v26  ;;  %374 = vtanh.f32 %v157_v27 }
 0x122   :  { %376 = vtanh.f32 %v158_v28 }
 0x12a   :  { %v375_v29 = vpop.eup %374 }
 0x12b   :  { %v161_v30 = vadd.f32 1.0, %v375_v29 }
 0x12c   :  { %v377_v31 = vpop.eup %376 }
 0x12d   :  { %v162_v34 = vadd.f32 1.0, %v377_v31  ;;  %v163_v35 = vmul.f32 %v161_v30, %v147_v32 }
 0x12f   :  { %v164_v36 = vmul.f32 %v162_v34, %v148_v33 }
 0x131   :  { %v167_v37 = vpack.c.bf16 %v164_v36, %v163_v35 }
 0x133   :  { %350 = vmatmul.mubr.bf16.vlgmr.msra.gmra.mrb[0].mxu1 %v167_v37 }
 0x206   :  { %v266_v39 = vpop.f32.mrb[0].mxu1 }
 0x207   :  { %v273_v40 = vadd.f32 %v299_v38, %v266_v39  ;;  %v351_v41 = vpop.f32.mrb[1].mxu1 }
 0x208   :  { %v269_v42 = vpop.f32.mrb[2].mxu1 }
 0x209   :  { %279 = vst [vmem:[#allocation9] sm:$0xff] %v273_v40  ;;  %v274_v43 = vadd.f32 %v299_v38, %v269_v42  ;;  %v352_v44 = vpop.f32.mrb[3].mxu1 }
 0x20b   :  { %280 = vst [vmem:[#allocation9 + $0x8] sm:$0xff] %v274_v43 }
 0x20c   :  { %455 = shalt.err (!%p452_p0)
}
 0x20d   :  { %s456_s10 = scalar_lea.hbm %s587_s5, 256 }
 0x20e   :  { %p457_p1 = scmp.ne.s32.totalorder %s587_s5, %s456_s10  ;;  %p460_p2 = scmp.lt.u32.totalorder %s456_s10, %s587_s5 }
 0x210   :  { %p462_p3 = pnand %p460_p2, %p457_p1 }
 0x212   :  { %465 = shalt.err (!%p462_p3)
}
 0x213   :  { %s480_s15 = smov 128   ;;  %s481_s16 = smov 8  }
 0x214   :  { %292 = dma.vmem_to_hbm [thread:$0]  %s287_s7, 256, %s587_s5, [#allocation5], %s480_s15, %s480_s15, %s481_s16  }
 0x215   :  { %470 = dma.done.wait [#allocation5], 256  }
 0x216   :  { %471 = vsyncadd [#allocation5], 4294967040 }
 0x217   :  { %296 = vsyncpa [#allocation4], 1 }
 0x218   :  { %297 = vsyncpa [#allocation7], 1 }
 0x219   :  { %298 = vsyncpa [#allocation5], 1 }

</bundles_post_ra>
